<compile_context>
chip_gen: v5e
topology: v5e:2x2
jax: 0.10.0
libtpu: 0.0.40
codegen_flags: <defaults>
</compile_context>

<pallas_src>
import math

import jax
import jax.numpy as jnp
from jax.experimental import pallas as pl
from jax.experimental.pallas import tpu as pltpu


def _sublane_pack(itemsize):
    # Sublanes per vreg/HBM tile: 8 for 32-bit, 16 for 16-bit, 32 for 8-bit.
    return 8 * max(1, 4 // itemsize)


def _pick_slab(total, itemsize):
    """Factor `total` into a lane-dense (rows, cols) slab.

    cols is a multiple of 128 (widest preferred); rows preferably a multiple of
    the sublane packing so the HBM layout has no lane padding.  Returns None
    when total is not a multiple of 128 (handled fine by the DMA path anyway).
    """
    sub = _sublane_pack(itemsize)
    lane_cands = (4096, 2048, 1024, 512, 256, 128)
    for cols in lane_cands:                      # fully packed rows preferred
        if total % cols == 0 and (total // cols) % sub == 0:
            return total // cols, cols
    for cols in lane_cands:                      # lane-dense at least
        if total % cols == 0:
            return total // cols, cols
    return None


def _row_chunks(rows, max_chunks, align):
    """Split [0, rows) into <= max_chunks contiguous chunks, boundaries aligned
    (when possible) to `align` rows so each DMA starts on a sublane-tile edge."""
    n = max(1, min(max_chunks, rows))
    bounds = [0]
    for i in range(1, n):
        b = (rows * i) // n
        b -= b % align
        if b <= bounds[-1]:
            continue
        bounds.append(b)
    if bounds[-1] != rows:
        bounds.append(rows)
    return [(bounds[i], bounds[i + 1] - bounds[i]) for i in range(len(bounds) - 1)]


def _make_dma_copy_kernel(chunks):
    """Kernel issuing one HBM->HBM async copy per (start, size) row chunk."""
    def kernel(x_hbm, o_hbm, sems):
        copies = []
        for i, (start, size) in enumerate(chunks):
            copies.append(
                pltpu.make_async_copy(
                    x_hbm.at[pl.ds(start, size), :],
                    o_hbm.at[pl.ds(start, size), :],
                    sems.at[i],
                )
            )
        for cp in copies:          # launch all chunks, let DMA engines overlap
            cp.start()
        for cp in copies:          # then wait for completion
            cp.wait()
    return kernel, len(chunks)


def reshape_forward(x, shape):
    """Pallas equivalent of Reshape(shape).forward(x) for a contiguous x."""
    b = x.shape[0]
    flat_n = math.prod(x.shape[1:]) if len(x.shape) > 1 else 1
    tgt_n = math.prod(shape)
    assert tgt_n == flat_n, (
        f"target shape {shape} incompatible with per-sample size {flat_n}")

    total = b * flat_n
    itemsize = jnp.dtype(x.dtype).itemsize

    slab = _pick_slab(total, itemsize)
    if slab is None:
        # Not a multiple of 128: keep the natural (batch, flat) slab.  The DMA
        # path has no (8,128) BlockSpec constraint, so this is fully general.
        rows, cols = b, flat_n
    else:
        rows, cols = slab

    sub = _sublane_pack(itemsize)
    chunks = _row_chunks(rows, max_chunks=8, align=sub)
    kernel, n_chunks = _make_dma_copy_kernel(chunks)

    x_slab = x.reshape(rows, cols)               # metadata only (contiguous)

    out_slab = pl.pallas_call(
        kernel,
        out_shape=jax.ShapeDtypeStruct((rows, cols), x.dtype),
        in_specs=[pl.BlockSpec(memory_space=pl.ANY)],    # raw HBM ref
        out_specs=pl.BlockSpec(memory_space=pl.ANY),     # raw HBM ref
        scratch_shapes=[pltpu.SemaphoreType.DMA((n_chunks,))],
        compiler_params=pltpu.CompilerParams(has_side_effects=True),
        cost_estimate=pl.CostEstimate(
            flops=0, transcendentals=0, bytes_accessed=2 * total * itemsize),
    )(x_slab)

    # Final target shape: metadata-only, same as torch .reshape on contiguous.
    return out_slab.reshape((b,) + tuple(shape))


if __name__ == "__main__":
    key = jax.random.PRNGKey(0)

    # Main case: small NCHW conv-style input, matching the PyTorch module.
    x = jax.random.normal(key, (2, 4, 16, 16), dtype=jnp.float32)
    target_shape = (16, 64)
    out = jax.block_until_ready(reshape_forward(x, target_shape))
    expected = x.reshape(x.shape[0], *target_shape)
    assert out.shape == (2, 16, 64), out.shape
    assert out.dtype == x.dtype
    assert bool(jnp.all(out == expected))

    # Non-128-divisible case (exercises the general DMA path, no VMEM tiling).
    x2 = jax.random.normal(jax.random.PRNGKey(1), (2, 3, 5), dtype=jnp.float32)
    out2 = jax.block_until_ready(reshape_forward(x2, (5, 3)))
    assert out2.shape == (2, 5, 3)
    assert bool(jnp.all(out2 == x2.reshape(2, 5, 3)))

    print("KERNEL_OK")
</pallas_src>

<mosaic_0001>
module attributes {stable_mosaic.version = 11 : i64} {
  func.func @kernel(%arg0: memref<8x256xf32, #tpu.memory_space<any>>, %arg1: memref<8x256xf32, #tpu.memory_space<any>>, %arg2: memref<1x!tpu.dma_semaphore, #tpu.memory_space<semaphore_mem>>) attributes {dimension_semantics = [], scalar_prefetch = 0 : i64, scratch_operands = 1 : i64, tpu.core_type = #tpu.core_type<tc>} {
    %c0_i32 = arith.constant 0 : i32
    %c0_i32_0 = arith.constant 0 : i32
    %c0_i32_1 = arith.constant 0 : i32
    %0 = tpu.memref_slice %arg0[%c0_i32_0, %c0_i32_1] : memref<8x256xf32, #tpu.memory_space<any>> -> memref<8x256xf32, #tpu.memory_space<any>>
    %c0_i32_2 = arith.constant 0 : i32
    %c0_i32_3 = arith.constant 0 : i32
    %1 = tpu.memref_slice %arg1[%c0_i32_2, %c0_i32_3] : memref<8x256xf32, #tpu.memory_space<any>> -> memref<8x256xf32, #tpu.memory_space<any>>
    %2 = tpu.memref_slice %arg2[%c0_i32] : memref<1x!tpu.dma_semaphore, #tpu.memory_space<semaphore_mem>> -> memref<1x!tpu.dma_semaphore, #tpu.memory_space<semaphore_mem>>
    %3 = tpu.memref_squeeze %2 : memref<1x!tpu.dma_semaphore, #tpu.memory_space<semaphore_mem>> -> memref<!tpu.dma_semaphore, #tpu.memory_space<semaphore_mem>>
    tpu.enqueue_dma source(%0 : memref<8x256xf32, #tpu.memory_space<any>>) target(%1 : memref<8x256xf32, #tpu.memory_space<any>>) target_semaphore(%3 : memref<!tpu.dma_semaphore, #tpu.memory_space<semaphore_mem>>)
    %c0_i32_4 = arith.constant 0 : i32
    %c0_i32_5 = arith.constant 0 : i32
    %c0_i32_6 = arith.constant 0 : i32
    %4 = tpu.memref_slice %arg0[%c0_i32_5, %c0_i32_6] : memref<8x256xf32, #tpu.memory_space<any>> -> memref<8x256xf32, #tpu.memory_space<any>>
    %c0_i32_7 = arith.constant 0 : i32
    %c0_i32_8 = arith.constant 0 : i32
    %5 = tpu.memref_slice %arg1[%c0_i32_7, %c0_i32_8] : memref<8x256xf32, #tpu.memory_space<any>> -> memref<8x256xf32, #tpu.memory_space<any>>
    %6 = tpu.memref_slice %arg2[%c0_i32_4] : memref<1x!tpu.dma_semaphore, #tpu.memory_space<semaphore_mem>> -> memref<1x!tpu.dma_semaphore, #tpu.memory_space<semaphore_mem>>
    %7 = tpu.memref_squeeze %6 : memref<1x!tpu.dma_semaphore, #tpu.memory_space<semaphore_mem>> -> memref<!tpu.dma_semaphore, #tpu.memory_space<semaphore_mem>>
    tpu.wait_dma2 semaphore(%7 : memref<!tpu.dma_semaphore, #tpu.memory_space<semaphore_mem>>) src(%4 : memref<8x256xf32, #tpu.memory_space<any>>) dst(%5 : memref<8x256xf32, #tpu.memory_space<any>>)
    return
  }
}

</mosaic_0001>

<bundles_post_ra>
// kernel: tpu_custom_call.1
= control target key start
LH: loop header
LB: loop body
LE: loop exit
PB: predicated region body
PF: predicated region fallthrough
CT: control target
= control target key end

     0   :  { %s33_s12 = smov [#allocation2]   ;;  %s34_s13 = smov [#allocation3]   ;;  %s52_s0 = inlined_call_operand.hbm [shape: f32[8,256], index: 0, kind: input, shape index: {}]   ;;  %s53_s1 = inlined_call_operand.hbm [shape: f32[8,256], index: 1, kind: output, shape index: {}]  }
   0x1   :  { %s10_s8 = sshll.u32 %s52_s0, 4  ;;  %s12_s11 = sshll.u32 %s53_s1, 4  ;;  %s11_s8 = int_to_ptr.hbm [resolvable:$true] %s10_s8  ;;  %s13_s11 = int_to_ptr.hbm [resolvable:$true] %s12_s11 }
   0x2   :  { %s35_s14 = smov 0  }
   0x3   :  { %16 = dma.general %s11_s8, 256, %s13_s11, %s33_s12, %s34_s13, [#allocation4], %s35_s14, 0  }
   0x4   :  { %31 = dma.done.wait [#allocation2], 256 }
   0x5   :  { %32 = vsyncadd [#allocation2], 4294967040 }
   0x6   :  { %21 = vsyncmov [#allocation2] }
   0x9   :  { %s22_s15 = vpop.sfrf %21 }
   0xa   :  { %p27_p0 = scmp.ne.s32.totalorder %s22_s15, 0 }
   0xc   :  { %26 = shalt.err (%p27_p0)  }

</bundles_post_ra>
